<compile_context>
chip_gen: v7x
topology: tpu7x:2x2x1
jax: 0.10.0
libtpu: 0.0.40
codegen_flags: <defaults>
</compile_context>

<pallas_src>
import jax
import jax.numpy as jnp
from jax import lax
from jax.experimental import pallas as pl
from jax.experimental.pallas import tpu as pltpu


def _make_spade_kernel(HW, PAD, Wx, C, CH, n_chunks):
    """Per-batch-element SPADE kernel (closure over static sizes)."""
    align8 = (Wx % 8 == 0) and (CH % 8 == 0) and (PAD % 8 == 0)

    def _hint8(idx):
        return pl.multiple_of(idx, 8) if align8 else idx

    def kernel(x_ref, s_ref, wcp_ref, bcp_ref, wgb_ref, bgb_ref, out_ref, t_ref):
        # Zero the vertical halo rows of the t scratch so the oh=+/-1 taps read exact
        # zeros (zero-padding semantics) without any vertical mask.
        t_ref[pl.ds(0, PAD), :] = jnp.zeros((PAD, C), jnp.float32)
        t_ref[pl.ds(PAD + HW, PAD), :] = jnp.zeros((PAD, C), jnp.float32)

        wcp = wcp_ref[...]          # (CIN_PAD, C) f32, tiny K
        bcp = bcp_ref[...]          # (1, C)       f32

        # ---- pass 1: t = leaky_relu(C_P(s))  (1x1 conv), valid rows only ----
        @pl.loop(0, n_chunks)
        def _(c):
            r0 = _hint8(c * CH)
            t = jnp.dot(s_ref[0, pl.ds(r0, CH), :], wcp,
                        preferred_element_type=jnp.float32) + bcp
            t_ref[pl.ds(_hint8(PAD + c * CH), CH), :] = jnp.where(t > 0, t, 0.01 * t)

        # ---- pass 2: gamma|beta via fused 3x3 convs, then x*gamma+beta ----
        @pl.loop(0, n_chunks)
        def _(c):
            r0 = c * CH
            # Horizontal-edge validity, computed in-kernel (chunk start % Wx == 0).
            col = lax.broadcasted_iota(jnp.int32, (CH, 1), 0) % Wx
            not_l = col > 0           # ow = -1 taps valid
            not_r = col < (Wx - 1)    # ow = +1 taps valid

            acc = jnp.zeros((CH, 2 * C), jnp.float32) + bgb_ref[...]
            for oh in (-1, 0, 1):
                for ow in (-1, 0, 1):
                    start = PAD + r0 + oh * Wx + ow
                    if ow == 0:
                        start = _hint8(start)   # the 3 vertical shifts stay 8-aligned
                    win = t_ref[pl.ds(start, CH), :]          # (CH, C) f32
                    if ow == -1:
                        win = jnp.where(not_l, win, 0.0)
                    elif ow == 1:
                        win = jnp.where(not_r, win, 0.0)
                    acc = acc + jnp.dot(win.astype(jnp.bfloat16),
                                        wgb_ref[(oh + 1) * 3 + (ow + 1)],
                                        preferred_element_type=jnp.float32)

            r0h = _hint8(r0)
            xs = x_ref[0, pl.ds(r0h, CH), :]
            out_ref[0, pl.ds(r0h, CH), :] = xs * acc[:, :C] + acc[:, C:]

    return kernel


def spade_forward(x_nchw, s_nchw, params):
    """SPADE.forward(x, s, normalize=False), NCHW in/out (PyTorch convention)."""
    # TODO(synk): normalize=True branch (mean/std over dims (0,2,3)) not implemented.
    W_cp, b_cp, W_g, b_g, W_b, b_b = params
    N, C, Hx, Wx = x_nchw.shape
    _, Cin, Hs, Ws = s_nchw.shape
    HW = Hx * Wx
    CIN_PAD = max(8, -(-Cin // 8) * 8)
    PAD = -(-(Wx + 1) // 8) * 8            # >= Wx+1, multiple of 8 (vertical halo)
    HWP = HW + 2 * PAD

    # HW chunking: an integer number of image rows per chunk (~64 sublanes), dividing Hx.
    RH = 1
    for d in range(1, Hx + 1):
        if Hx % d == 0 and d * Wx <= 64:
            RH = d
    CH = RH * Wx
    n_chunks = Hx // RH

    # --- glue: NCHW -> flattened NHWC; nearest-upsample seg map to x's resolution ---
    x = jnp.transpose(x_nchw, (0, 2, 3, 1)).reshape(N, HW, C)
    s = jnp.transpose(s_nchw, (0, 2, 3, 1))
    hi = (jnp.arange(Hx) * Hs) // Hx                 # PyTorch 'nearest'
    wi = (jnp.arange(Wx) * Ws) // Wx
    s_up = s[:, hi][:, :, wi].reshape(N, HW, Cin)
    s_up = jnp.pad(s_up, ((0, 0), (0, 0), (0, CIN_PAD - Cin)))

    # --- glue: weight re-layout; gamma/beta 3x3 weights fused along Cout, bf16 ---
    wcp = jnp.zeros((CIN_PAD, C), jnp.float32).at[:Cin].set(W_cp[:, :, 0, 0].T)
    wg = jnp.transpose(W_g, (2, 3, 1, 0)).reshape(9, C, C)
    wb = jnp.transpose(W_b, (2, 3, 1, 0)).reshape(9, C, C)
    wgb = jnp.concatenate([wg, wb], axis=-1).astype(jnp.bfloat16)     # (9, C, 2C)
    bcp = b_cp.reshape(1, C).astype(jnp.float32)
    bgb = jnp.concatenate([b_g, b_b]).reshape(1, 2 * C).astype(jnp.float32)

    kernel = _make_spade_kernel(HW, PAD, Wx, C, CH, n_chunks)
    out_flat = pl.pallas_call(
        kernel,
        out_shape=jax.ShapeDtypeStruct((N, HW, C), jnp.float32),
        grid_spec=pltpu.PrefetchScalarGridSpec(
            num_scalar_prefetch=0,
            grid=(N,),
            in_specs=[
                pl.BlockSpec((1, HW, C), lambda n: (n, 0, 0)),         # x
                pl.BlockSpec((1, HW, CIN_PAD), lambda n: (n, 0, 0)),   # upsampled seg map
                pl.BlockSpec((CIN_PAD, C), lambda n: (0, 0)),          # W_cp (f32)
                pl.BlockSpec((1, C), lambda n: (0, 0)),                # b_cp
                pl.BlockSpec((9, C, 2 * C), lambda n: (0, 0, 0)),      # fused W_g|W_b (bf16)
                pl.BlockSpec((1, 2 * C), lambda n: (0, 0)),            # fused b_g|b_b
            ],
            out_specs=pl.BlockSpec((1, HW, C), lambda n: (n, 0, 0)),
            scratch_shapes=[pltpu.VMEM((HWP, C), jnp.float32)],
        ),
        compiler_params=pltpu.CompilerParams(
            dimension_semantics=("parallel",)),
        # TODO(synk): for production H*W, add a haloed spatial grid axis and a
        # lane-dense (N, HW*C//128, 128) output layout; unnecessary at this toy size.
    )(x, s_up, wcp, bcp, wgb, bgb)

    # glue: back to NCHW to match PyTorch convention
    return jnp.transpose(out_flat.reshape(N, Hx, Wx, C), (0, 3, 1, 2))


def spade_reference(x, s, params):
    """Pure-JAX (XLA) reference mirroring the PyTorch module, NCHW."""
    W_cp, b_cp, W_g, b_g, W_b, b_b = params
    N, C, Hx, Wx = x.shape
    _, _, Hs, Ws = s.shape
    dn = ("NCHW", "OIHW", "NCHW")
    s1 = lax.conv_general_dilated(s, W_cp, (1, 1), "VALID", dimension_numbers=dn)
    s1 = s1 + b_cp[None, :, None, None]
    s1 = jnp.where(s1 > 0, s1, 0.01 * s1)
    hi = (jnp.arange(Hx) * Hs) // Hx
    wi = (jnp.arange(Wx) * Ws) // Wx
    s1 = s1[:, :, hi][:, :, :, wi]
    gamma = lax.conv_general_dilated(s1, W_g, (1, 1), ((1, 1), (1, 1)),
                                     dimension_numbers=dn) + b_g[None, :, None, None]
    beta = lax.conv_general_dilated(s1, W_b, (1, 1), ((1, 1), (1, 1)),
                                    dimension_numbers=dn) + b_b[None, :, None, None]
    return x * gamma + beta


if __name__ == "__main__":
    key = jax.random.PRNGKey(0)
    N, Cin, C = 2, 3, 32          # out_channels=32, in_channels=3 (module default)
    Hx = Wx = 16                  # x spatial
    Hs = Ws = 8                   # seg-map spatial (scale_factor = 2, nearest)
    ks = jax.random.split(key, 8)
    x = jax.random.normal(ks[0], (N, C, Hx, Wx), jnp.float32)
    s = jax.random.normal(ks[1], (N, Cin, Hs, Ws), jnp.float32)
    # deterministic synthetic parameters (PyTorch Conv2d weight layouts)
    W_cp = 0.2 * jax.random.normal(ks[2], (C, Cin, 1, 1), jnp.float32)
    b_cp = 0.1 * jax.random.normal(ks[3], (C,), jnp.float32)
    W_g = 0.1 * jax.random.normal(ks[4], (C, C, 3, 3), jnp.float32)
    b_g = 0.1 * jax.random.normal(ks[5], (C,), jnp.float32)
    W_b = 0.1 * jax.random.normal(ks[6], (C, C, 3, 3), jnp.float32)
    b_b = 0.1 * jax.random.normal(ks[7], (C,), jnp.float32)
    params = (W_cp, b_cp, W_g, b_g, W_b, b_b)

    out = spade_forward(x, s, params)
    out = jax.block_until_ready(out)

    ref = jax.block_until_ready(spade_reference(x, s, params))
    assert out.shape == (N, C, Hx, Wx)
    err = float(jnp.max(jnp.abs(out - ref)))
    assert err < 5e-2, f"max abs error vs reference: {err}"
    print("KERNEL_OK")
</pallas_src>

<mosaic_0001>
module attributes {stable_mosaic.version = 11 : i64} {
  func.func @kernel(%arg0: i32, %arg1: memref<1x256x32xf32, #tpu.memory_space<vmem>>, %arg2: memref<1x256x8xf32, #tpu.memory_space<vmem>>, %arg3: memref<8x32xf32, #tpu.memory_space<vmem>>, %arg4: memref<1x32xf32, #tpu.memory_space<vmem>>, %arg5: memref<9x32x64xbf16, #tpu.memory_space<vmem>>, %arg6: memref<1x64xf32, #tpu.memory_space<vmem>>, %arg7: memref<1x256x32xf32, #tpu.memory_space<vmem>>, %arg8: memref<304x32xf32, #tpu.memory_space<vmem>>) attributes {dimension_semantics = [#tpu.dimension_semantics<parallel>], iteration_bounds = array<i64: 2>, scalar_prefetch = 0 : i64, scratch_operands = 1 : i64, tpu.core_type = #tpu.core_type<tc>, window_params = [{transform_indices = @transform_0, window_bounds = array<i64: 1, 256, 32>}, {transform_indices = @transform_1, window_bounds = array<i64: 1, 256, 8>}, {pipeline_mode = #tpu.pipeline_mode<synchronous>, transform_indices = @transform_2, window_bounds = array<i64: 8, 32>}, {pipeline_mode = #tpu.pipeline_mode<synchronous>, transform_indices = @transform_3, window_bounds = array<i64: 1, 32>}, {pipeline_mode = #tpu.pipeline_mode<synchronous>, transform_indices = @transform_4, window_bounds = array<i64: 9, 32, 64>}, {pipeline_mode = #tpu.pipeline_mode<synchronous>, transform_indices = @transform_5, window_bounds = array<i64: 1, 64>}, {transform_indices = @transform_6, window_bounds = array<i64: 1, 256, 32>}]} {
    %cst = arith.constant 0.000000e+00 : f32
    %0 = vector.broadcast %cst : f32 to vector<24x32xf32>
    %c0 = arith.constant 0 : index
    %c0_0 = arith.constant 0 : index
    %1 = vector.load %arg8[%c0, %c0_0] : memref<304x32xf32, #tpu.memory_space<vmem>>, vector<24x32xf32>
    tpu.vector_store %arg8[%c0, %c0_0], %0 {strides = array<i32>} : memref<304x32xf32, #tpu.memory_space<vmem>>, vector<24x32xf32>,
    %cst_1 = arith.constant 0.000000e+00 : f32
    %2 = vector.broadcast %cst_1 : f32 to vector<24x32xf32>
    %c280 = arith.constant 280 : index
    %c0_2 = arith.constant 0 : index
    %3 = vector.load %arg8[%c280, %c0_2] : memref<304x32xf32, #tpu.memory_space<vmem>>, vector<24x32xf32>
    tpu.vector_store %arg8[%c280, %c0_2], %2 {strides = array<i32>} : memref<304x32xf32, #tpu.memory_space<vmem>>, vector<24x32xf32>,
    %c0_3 = arith.constant 0 : index
    %c0_4 = arith.constant 0 : index
    %4 = vector.load %arg3[%c0_3, %c0_4] : memref<8x32xf32, #tpu.memory_space<vmem>>, vector<8x32xf32>
    %c0_5 = arith.constant 0 : index
    %c0_6 = arith.constant 0 : index
    %5 = vector.load %arg4[%c0_5, %c0_6] : memref<1x32xf32, #tpu.memory_space<vmem>>, vector<1x32xf32>
    %c0_i32 = arith.constant 0 : i32
    %c4_i32 = arith.constant 4 : i32
    %6 = arith.addi %c0_i32, %c4_i32 : i32
    %c1_i32 = arith.constant 1 : i32
    scf.for %arg9 = %c0_i32 to %6 step %c1_i32  : i32 {
      %c1_i32_12 = arith.constant 1 : i32
      %8 = arith.muli %arg9, %c1_i32_12 : i32
      %c0_i32_13 = arith.constant 0 : i32
      %9 = arith.addi %c0_i32_13, %8 : i32
      %c64_i32 = arith.constant 64 : i32
      %10 = arith.muli %9, %c64_i32 : i32
      %11 = tpu.assume_multiple %10, 8 : i32
      %c0_14 = arith.constant 0 : index
      %12 = arith.index_cast %11 : i32 to index
      %c0_15 = arith.constant 0 : index
      %13 = vector.load %arg2[%c0_14, %12, %c0_15] : memref<1x256x8xf32, #tpu.memory_space<vmem>>, vector<1x64x8xf32>
      %14 = vector.shape_cast %13 : vector<1x64x8xf32> to vector<64x8xf32>
      %cst_16 = arith.constant dense<0.000000e+00> : vector<64x32xf32>
      %15 = tpu.matmul %14, %4, %cst_16 {dimension_numbers = #tpu.dot_dimension_numbers<[1], [0], [0], [1], [0, 0, 1, 1], [], []>} : vector<64x8xf32>, vector<8x32xf32>, vector<64x32xf32> -> vector<64x32xf32>
      %16 = vector.broadcast %5 : vector<1x32xf32> to vector<64x32xf32>
      %17 = arith.addf %15, %16 : vector<64x32xf32>
      %cst_17 = arith.constant 0.000000e+00 : f32
      %18 = vector.broadcast %cst_17 : f32 to vector<64x32xf32>
      %19 = arith.cmpf ogt, %17, %18 : vector<64x32xf32>
      %cst_18 = arith.constant 0.00999999977 : f32
      %20 = vector.broadcast %cst_18 : f32 to vector<64x32xf32>
      %21 = arith.mulf %20, %17 : vector<64x32xf32>
      %22 = arith.select %19, %17, %21 : vector<64x32xi1>, vector<64x32xf32>
      %c64_i32_19 = arith.constant 64 : i32
      %23 = arith.muli %9, %c64_i32_19 : i32
      %c24_i32 = arith.constant 24 : i32
      %24 = arith.addi %c24_i32, %23 : i32
      %25 = tpu.assume_multiple %24, 8 : i32
      %26 = arith.index_cast %25 : i32 to index
      %c0_20 = arith.constant 0 : index
      %27 = vector.load %arg8[%26, %c0_20] : memref<304x32xf32, #tpu.memory_space<vmem>>, vector<64x32xf32>
      tpu.vector_store %arg8[%26, %c0_20], %22 {strides = array<i32>} : memref<304x32xf32, #tpu.memory_space<vmem>>, vector<64x32xf32>,
    }
    %c4_i32_7 = arith.constant 4 : i32
    %c0_i32_8 = arith.constant 0 : i32
    %c4_i32_9 = arith.constant 4 : i32
    %7 = arith.addi %c0_i32_8, %c4_i32_9 : i32
    %c1_i32_10 = arith.constant 1 : i32
    scf.for %arg9 = %c0_i32_8 to %7 step %c1_i32_10  : i32 {
      %c1_i32_12 = arith.constant 1 : i32
      %8 = arith.muli %arg9, %c1_i32_12 : i32
      %c0_i32_13 = arith.constant 0 : i32
      %9 = arith.addi %c0_i32_13, %8 : i32
      %c64_i32 = arith.constant 64 : i32
      %10 = arith.muli %9, %c64_i32 : i32
      %11 = tpu.iota {dimensions = array<i32: 0>} : vector<64x1xi32>
      %c16_i32 = arith.constant 16 : i32
      %c0_i32_14 = arith.constant 0 : i32
      %12 = arith.cmpi eq, %c16_i32, %c0_i32_14 : i32
      %c1_i32_15 = arith.constant 1 : i32
      %13 = arith.select %12, %c1_i32_15, %c16_i32 : i32
      %14 = vector.broadcast %13 : i32 to vector<64x1xi32>
      %15 = arith.remsi %11, %14 : vector<64x1xi32>
      %c0_i32_16 = arith.constant 0 : i32
      %16 = vector.broadcast %c0_i32_16 : i32 to vector<64x1xi32>
      %17 = arith.cmpi ne, %15, %16 : vector<64x1xi32>
      %c0_i32_17 = arith.constant 0 : i32
      %18 = vector.broadcast %c0_i32_17 : i32 to vector<64x1xi32>
      %19 = arith.cmpi slt, %15, %18 : vector<64x1xi32>
      %c0_i32_18 = arith.constant 0 : i32
      %20 = arith.cmpi slt, %13, %c0_i32_18 : i32
      %21 = vector.broadcast %20 : i1 to vector<64x1xi1>
      %22 = vector.broadcast %21 : vector<64x1xi1> to vector<64x1xi1>
      %23 = arith.xori %19, %22 : vector<64x1xi1>
      %24 = arith.andi %23, %17 : vector<64x1xi1>
      %25 = vector.broadcast %13 : i32 to vector<64x1xi32>
      %26 = arith.addi %15, %25 : vector<64x1xi32>
      %27 = arith.select %24, %26, %15 : vector<64x1xi1>, vector<64x1xi32>
      %c0_i32_19 = arith.constant 0 : i32
      %28 = vector.broadcast %c0_i32_19 : i32 to vector<64x1xi32>
      %29 = arith.cmpi sgt, %27, %28 : vector<64x1xi32>
      %c15_i32 = arith.constant 15 : i32
      %30 = vector.broadcast %c15_i32 : i32 to vector<64x1xi32>
      %31 = arith.cmpi slt, %27, %30 : vector<64x1xi32>
      %cst_20 = arith.constant 0.000000e+00 : f32
      %32 = vector.broadcast %cst_20 : f32 to vector<64x64xf32>
      %c0_21 = arith.constant 0 : index
      %c0_22 = arith.constant 0 : index
      %33 = vector.load %arg6[%c0_21, %c0_22] : memref<1x64xf32, #tpu.memory_space<vmem>>, vector<1x64xf32>
      %34 = vector.broadcast %33 : vector<1x64xf32> to vector<64x64xf32>
      %35 = arith.addf %32, %34 : vector<64x64xf32>
      %c24_i32 = arith.constant 24 : i32
      %36 = arith.addi %c24_i32, %10 : i32
      %c-16_i32 = arith.constant -16 : i32
      %37 = arith.addi %36, %c-16_i32 : i32
      %c-1_i32 = arith.constant -1 : i32
      %38 = arith.addi %37, %c-1_i32 : i32
      %39 = arith.index_cast %38 : i32 to index
      %c0_23 = arith.constant 0 : index
      %40 = vector.load %arg8[%39, %c0_23] : memref<304x32xf32, #tpu.memory_space<vmem>>, vector<64x32xf32>
      %cst_24 = arith.constant 0.000000e+00 : f32
      %41 = vector.shape_cast %29 : vector<64x1xi1> to vector<64x1xi1>
      %42 = vector.broadcast %41 : vector<64x1xi1> to vector<64x32xi1>
      %43 = vector.broadcast %cst_24 : f32 to vector<64x32xf32>
      %44 = arith.select %42, %40, %43 : vector<64x32xi1>, vector<64x32xf32>
      %45 = arith.truncf %44 : vector<64x32xf32> to vector<64x32xbf16>
      %c0_25 = arith.constant 0 : index
      %c0_26 = arith.constant 0 : index
      %c0_27 = arith.constant 0 : index
      %46 = vector.load %arg5[%c0_25, %c0_26, %c0_27] : memref<9x32x64xbf16, #tpu.memory_space<vmem>>, vector<1x32x64xbf16>
      %47 = vector.shape_cast %46 : vector<1x32x64xbf16> to vector<32x64xbf16>
      %cst_28 = arith.constant dense<0.000000e+00> : vector<64x64xf32>
      %48 = tpu.matmul %45, %47, %cst_28 {dimension_numbers = #tpu.dot_dimension_numbers<[1], [0], [0], [1], [0, 0, 1, 1], [], []>} : vector<64x32xbf16>, vector<32x64xbf16>, vector<64x64xf32> -> vector<64x64xf32>
      %49 = arith.addf %35, %48 : vector<64x64xf32>
      %c24_i32_29 = arith.constant 24 : i32
      %50 = arith.addi %c24_i32_29, %10 : i32
      %c-16_i32_30 = arith.constant -16 : i32
      %51 = arith.addi %50, %c-16_i32_30 : i32
      %c0_i32_31 = arith.constant 0 : i32
      %52 = arith.addi %51, %c0_i32_31 : i32
      %53 = tpu.assume_multiple %52, 8 : i32
      %54 = arith.index_cast %53 : i32 to index
      %c0_32 = arith.constant 0 : index
      %55 = vector.load %arg8[%54, %c0_32] : memref<304x32xf32, #tpu.memory_space<vmem>>, vector<64x32xf32>
      %56 = arith.truncf %55 : vector<64x32xf32> to vector<64x32xbf16>
      %c1 = arith.constant 1 : index
      %c0_33 = arith.constant 0 : index
      %c0_34 = arith.constant 0 : index
      %57 = vector.load %arg5[%c1, %c0_33, %c0_34] : memref<9x32x64xbf16, #tpu.memory_space<vmem>>, vector<1x32x64xbf16>
      %58 = vector.shape_cast %57 : vector<1x32x64xbf16> to vector<32x64xbf16>
      %cst_35 = arith.constant dense<0.000000e+00> : vector<64x64xf32>
      %59 = tpu.matmul %56, %58, %cst_35 {dimension_numbers = #tpu.dot_dimension_numbers<[1], [0], [0], [1], [0, 0, 1, 1], [], []>} : vector<64x32xbf16>, vector<32x64xbf16>, vector<64x64xf32> -> vector<64x64xf32>
      %60 = arith.addf %49, %59 : vector<64x64xf32>
      %c24_i32_36 = arith.constant 24 : i32
      %61 = arith.addi %c24_i32_36, %10 : i32
      %c-16_i32_37 = arith.constant -16 : i32
      %62 = arith.addi %61, %c-16_i32_37 : i32
      %c1_i32_38 = arith.constant 1 : i32
      %63 = arith.addi %62, %c1_i32_38 : i32
      %64 = arith.index_cast %63 : i32 to index
      %c0_39 = arith.constant 0 : index
      %65 = vector.load %arg8[%64, %c0_39] : memref<304x32xf32, #tpu.memory_space<vmem>>, vector<64x32xf32>
      %cst_40 = arith.constant 0.000000e+00 : f32
      %66 = vector.shape_cast %31 : vector<64x1xi1> to vector<64x1xi1>
      %67 = vector.broadcast %66 : vector<64x1xi1> to vector<64x32xi1>
      %68 = vector.broadcast %cst_40 : f32 to vector<64x32xf32>
      %69 = arith.select %67, %65, %68 : vector<64x32xi1>, vector<64x32xf32>
      %70 = arith.truncf %69 : vector<64x32xf32> to vector<64x32xbf16>
      %c2 = arith.constant 2 : index
      %c0_41 = arith.constant 0 : index
      %c0_42 = arith.constant 0 : index
      %71 = vector.load %arg5[%c2, %c0_41, %c0_42] : memref<9x32x64xbf16, #tpu.memory_space<vmem>>, vector<1x32x64xbf16>
      %72 = vector.shape_cast %71 : vector<1x32x64xbf16> to vector<32x64xbf16>
      %cst_43 = arith.constant dense<0.000000e+00> : vector<64x64xf32>
      %73 = tpu.matmul %70, %72, %cst_43 {dimension_numbers = #tpu.dot_dimension_numbers<[1], [0], [0], [1], [0, 0, 1, 1], [], []>} : vector<64x32xbf16>, vector<32x64xbf16>, vector<64x64xf32> -> vector<64x64xf32>
      %74 = arith.addf %60, %73 : vector<64x64xf32>
      %c24_i32_44 = arith.constant 24 : i32
      %75 = arith.addi %c24_i32_44, %10 : i32
      %c0_i32_45 = arith.constant 0 : i32
      %76 = arith.addi %75, %c0_i32_45 : i32
      %c-1_i32_46 = arith.constant -1 : i32
      %77 = arith.addi %76, %c-1_i32_46 : i32
      %78 = arith.index_cast %77 : i32 to index
      %c0_47 = arith.constant 0 : index
      %79 = vector.load %arg8[%78, %c0_47] : memref<304x32xf32, #tpu.memory_space<vmem>>, vector<64x32xf32>
      %cst_48 = arith.constant 0.000000e+00 : f32
      %80 = vector.shape_cast %29 : vector<64x1xi1> to vector<64x1xi1>
      %81 = vector.broadcast %80 : vector<64x1xi1> to vector<64x32xi1>
      %82 = vector.broadcast %cst_48 : f32 to vector<64x32xf32>
      %83 = arith.select %81, %79, %82 : vector<64x32xi1>, vector<64x32xf32>
      %84 = arith.truncf %83 : vector<64x32xf32> to vector<64x32xbf16>
      %c3 = arith.constant 3 : index
      %c0_49 = arith.constant 0 : index
      %c0_50 = arith.constant 0 : index
      %85 = vector.load %arg5[%c3, %c0_49, %c0_50] : memref<9x32x64xbf16, #tpu.memory_space<vmem>>, vector<1x32x64xbf16>
      %86 = vector.shape_cast %85 : vector<1x32x64xbf16> to vector<32x64xbf16>
      %cst_51 = arith.constant dense<0.000000e+00> : vector<64x64xf32>
      %87 = tpu.matmul %84, %86, %cst_51 {dimension_numbers = #tpu.dot_dimension_numbers<[1], [0], [0], [1], [0, 0, 1, 1], [], []>} : vector<64x32xbf16>, vector<32x64xbf16>, vector<64x64xf32> -> vector<64x64xf32>
      %88 = arith.addf %74, %87 : vector<64x64xf32>
      %c24_i32_52 = arith.constant 24 : i32
      %89 = arith.addi %c24_i32_52, %10 : i32
      %c0_i32_53 = arith.constant 0 : i32
      %90 = arith.addi %89, %c0_i32_53 : i32
      %c0_i32_54 = arith.constant 0 : i32
      %91 = arith.addi %90, %c0_i32_54 : i32
      %92 = tpu.assume_multiple %91, 8 : i32
      %93 = arith.index_cast %92 : i32 to index
      %c0_55 = arith.constant 0 : index
      %94 = vector.load %arg8[%93, %c0_55] : memref<304x32xf32, #tpu.memory_space<vmem>>, vector<64x32xf32>
      %95 = arith.truncf %94 : vector<64x32xf32> to vector<64x32xbf16>
      %c4 = arith.constant 4 : index
      %c0_56 = arith.constant 0 : index
      %c0_57 = arith.constant 0 : index
      %96 = vector.load %arg5[%c4, %c0_56, %c0_57] : memref<9x32x64xbf16, #tpu.memory_space<vmem>>, vector<1x32x64xbf16>
      %97 = vector.shape_cast %96 : vector<1x32x64xbf16> to vector<32x64xbf16>
      %cst_58 = arith.constant dense<0.000000e+00> : vector<64x64xf32>
      %98 = tpu.matmul %95, %97, %cst_58 {dimension_numbers = #tpu.dot_dimension_numbers<[1], [0], [0], [1], [0, 0, 1, 1], [], []>} : vector<64x32xbf16>, vector<32x64xbf16>, vector<64x64xf32> -> vector<64x64xf32>
      %99 = arith.addf %88, %98 : vector<64x64xf32>
      %c24_i32_59 = arith.constant 24 : i32
      %100 = arith.addi %c24_i32_59, %10 : i32
      %c0_i32_60 = arith.constant 0 : i32
      %101 = arith.addi %100, %c0_i32_60 : i32
      %c1_i32_61 = arith.constant 1 : i32
      %102 = arith.addi %101, %c1_i32_61 : i32
      %103 = arith.index_cast %102 : i32 to index
      %c0_62 = arith.constant 0 : index
      %104 = vector.load %arg8[%103, %c0_62] : memref<304x32xf32, #tpu.memory_space<vmem>>, vector<64x32xf32>
      %cst_63 = arith.constant 0.000000e+00 : f32
      %105 = vector.shape_cast %31 : vector<64x1xi1> to vector<64x1xi1>
      %106 = vector.broadcast %105 : vector<64x1xi1> to vector<64x32xi1>
      %107 = vector.broadcast %cst_63 : f32 to vector<64x32xf32>
      %108 = arith.select %106, %104, %107 : vector<64x32xi1>, vector<64x32xf32>
      %109 = arith.truncf %108 : vector<64x32xf32> to vector<64x32xbf16>
      %c5 = arith.constant 5 : index
      %c0_64 = arith.constant 0 : index
      %c0_65 = arith.constant 0 : index
      %110 = vector.load %arg5[%c5, %c0_64, %c0_65] : memref<9x32x64xbf16, #tpu.memory_space<vmem>>, vector<1x32x64xbf16>
      %111 = vector.shape_cast %110 : vector<1x32x64xbf16> to vector<32x64xbf16>
      %cst_66 = arith.constant dense<0.000000e+00> : vector<64x64xf32>
      %112 = tpu.matmul %109, %111, %cst_66 {dimension_numbers = #tpu.dot_dimension_numbers<[1], [0], [0], [1], [0, 0, 1, 1], [], []>} : vector<64x32xbf16>, vector<32x64xbf16>, vector<64x64xf32> -> vector<64x64xf32>
      %113 = arith.addf %99, %112 : vector<64x64xf32>
      %c24_i32_67 = arith.constant 24 : i32
      %114 = arith.addi %c24_i32_67, %10 : i32
      %c16_i32_68 = arith.constant 16 : i32
      %115 = arith.addi %114, %c16_i32_68 : i32
      %c-1_i32_69 = arith.constant -1 : i32
      %116 = arith.addi %115, %c-1_i32_69 : i32
      %117 = arith.index_cast %116 : i32 to index
      %c0_70 = arith.constant 0 : index
      %118 = vector.load %arg8[%117, %c0_70] : memref<304x32xf32, #tpu.memory_space<vmem>>, vector<64x32xf32>
      %cst_71 = arith.constant 0.000000e+00 : f32
      %119 = vector.shape_cast %29 : vector<64x1xi1> to vector<64x1xi1>
      %120 = vector.broadcast %119 : vector<64x1xi1> to vector<64x32xi1>
      %121 = vector.broadcast %cst_71 : f32 to vector<64x32xf32>
      %122 = arith.select %120, %118, %121 : vector<64x32xi1>, vector<64x32xf32>
      %123 = arith.truncf %122 : vector<64x32xf32> to vector<64x32xbf16>
      %c6 = arith.constant 6 : index
      %c0_72 = arith.constant 0 : index
      %c0_73 = arith.constant 0 : index
      %124 = vector.load %arg5[%c6, %c0_72, %c0_73] : memref<9x32x64xbf16, #tpu.memory_space<vmem>>, vector<1x32x64xbf16>
      %125 = vector.shape_cast %124 : vector<1x32x64xbf16> to vector<32x64xbf16>
      %cst_74 = arith.constant dense<0.000000e+00> : vector<64x64xf32>
      %126 = tpu.matmul %123, %125, %cst_74 {dimension_numbers = #tpu.dot_dimension_numbers<[1], [0], [0], [1], [0, 0, 1, 1], [], []>} : vector<64x32xbf16>, vector<32x64xbf16>, vector<64x64xf32> -> vector<64x64xf32>
      %127 = arith.addf %113, %126 : vector<64x64xf32>
      %c24_i32_75 = arith.constant 24 : i32
      %128 = arith.addi %c24_i32_75, %10 : i32
      %c16_i32_76 = arith.constant 16 : i32
      %129 = arith.addi %128, %c16_i32_76 : i32
      %c0_i32_77 = arith.constant 0 : i32
      %130 = arith.addi %129, %c0_i32_77 : i32
      %131 = tpu.assume_multiple %130, 8 : i32
      %132 = arith.index_cast %131 : i32 to index
      %c0_78 = arith.constant 0 : index
      %133 = vector.load %arg8[%132, %c0_78] : memref<304x32xf32, #tpu.memory_space<vmem>>, vector<64x32xf32>
      %134 = arith.truncf %133 : vector<64x32xf32> to vector<64x32xbf16>
      %c7 = arith.constant 7 : index
      %c0_79 = arith.constant 0 : index
      %c0_80 = arith.constant 0 : index
      %135 = vector.load %arg5[%c7, %c0_79, %c0_80] : memref<9x32x64xbf16, #tpu.memory_space<vmem>>, vector<1x32x64xbf16>
      %136 = vector.shape_cast %135 : vector<1x32x64xbf16> to vector<32x64xbf16>
      %cst_81 = arith.constant dense<0.000000e+00> : vector<64x64xf32>
      %137 = tpu.matmul %134, %136, %cst_81 {dimension_numbers = #tpu.dot_dimension_numbers<[1], [0], [0], [1], [0, 0, 1, 1], [], []>} : vector<64x32xbf16>, vector<32x64xbf16>, vector<64x64xf32> -> vector<64x64xf32>
      %138 = arith.addf %127, %137 : vector<64x64xf32>
      %c24_i32_82 = arith.constant 24 : i32
      %139 = arith.addi %c24_i32_82, %10 : i32
      %c16_i32_83 = arith.constant 16 : i32
      %140 = arith.addi %139, %c16_i32_83 : i32
      %c1_i32_84 = arith.constant 1 : i32
      %141 = arith.addi %140, %c1_i32_84 : i32
      %142 = arith.index_cast %141 : i32 to index
      %c0_85 = arith.constant 0 : index
      %143 = vector.load %arg8[%142, %c0_85] : memref<304x32xf32, #tpu.memory_space<vmem>>, vector<64x32xf32>
      %cst_86 = arith.constant 0.000000e+00 : f32
      %144 = vector.shape_cast %31 : vector<64x1xi1> to vector<64x1xi1>
      %145 = vector.broadcast %144 : vector<64x1xi1> to vector<64x32xi1>
      %146 = vector.broadcast %cst_86 : f32 to vector<64x32xf32>
      %147 = arith.select %145, %143, %146 : vector<64x32xi1>, vector<64x32xf32>
      %148 = arith.truncf %147 : vector<64x32xf32> to vector<64x32xbf16>
      %c8 = arith.constant 8 : index
      %c0_87 = arith.constant 0 : index
      %c0_88 = arith.constant 0 : index
      %149 = vector.load %arg5[%c8, %c0_87, %c0_88] : memref<9x32x64xbf16, #tpu.memory_space<vmem>>, vector<1x32x64xbf16>
      %150 = vector.shape_cast %149 : vector<1x32x64xbf16> to vector<32x64xbf16>
      %cst_89 = arith.constant dense<0.000000e+00> : vector<64x64xf32>
      %151 = tpu.matmul %148, %150, %cst_89 {dimension_numbers = #tpu.dot_dimension_numbers<[1], [0], [0], [1], [0, 0, 1, 1], [], []>} : vector<64x32xbf16>, vector<32x64xbf16>, vector<64x64xf32> -> vector<64x64xf32>
      %152 = arith.addf %138, %151 : vector<64x64xf32>
      %153 = tpu.assume_multiple %10, 8 : i32
      %c0_90 = arith.constant 0 : index
      %154 = arith.index_cast %153 : i32 to index
      %c0_91 = arith.constant 0 : index
      %155 = vector.load %arg1[%c0_90, %154, %c0_91] : memref<1x256x32xf32, #tpu.memory_space<vmem>>, vector<1x64x32xf32>
      %156 = vector.shape_cast %155 : vector<1x64x32xf32> to vector<64x32xf32>
      %157 = vector.extract_strided_slice %152 {offsets = [0, 0], sizes = [64, 32], strides = [1, 1]} : vector<64x64xf32> to vector<64x32xf32>
      %158 = arith.mulf %156, %157 : vector<64x32xf32>
      %159 = vector.extract_strided_slice %152 {offsets = [0, 32], sizes = [64, 32], strides = [1, 1]} : vector<64x64xf32> to vector<64x32xf32>
      %160 = arith.addf %158, %159 : vector<64x32xf32>
      %c0_92 = arith.constant 0 : index
      %161 = arith.index_cast %153 : i32 to index
      %c0_93 = arith.constant 0 : index
      %162 = vector.load %arg7[%c0_92, %161, %c0_93] : memref<1x256x32xf32, #tpu.memory_space<vmem>>, vector<1x64x32xf32>
      %163 = vector.shape_cast %162 : vector<1x64x32xf32> to vector<64x32xf32>
      %164 = vector.shape_cast %160 : vector<64x32xf32> to vector<1x64x32xf32>
      tpu.vector_store %arg7[%c0_92, %161, %c0_93], %164 {strides = array<i32>} : memref<1x256x32xf32, #tpu.memory_space<vmem>>, vector<1x64x32xf32>,
    }
    %c4_i32_11 = arith.constant 4 : i32
    return
  }
  func.func @transform_0(%arg0: i32) -> (i32, i32, i32) {
    %c0_i32 = arith.constant 0 : i32
    %c0_i32_0 = arith.constant 0 : i32
    %c0_i32_1 = arith.constant 0 : i32
    return %arg0, %c0_i32, %c0_i32_0 : i32, i32, i32
  }
  func.func @transform_1(%arg0: i32) -> (i32, i32, i32) {
    %c0_i32 = arith.constant 0 : i32
    %c0_i32_0 = arith.constant 0 : i32
    %c0_i32_1 = arith.constant 0 : i32
    return %arg0, %c0_i32, %c0_i32_0 : i32, i32, i32
  }
  func.func @transform_2(%arg0: i32) -> (i32, i32) {
    %c0_i32 = arith.constant 0 : i32
    %c0_i32_0 = arith.constant 0 : i32
    %c0_i32_1 = arith.constant 0 : i32
    return %c0_i32, %c0_i32_0 : i32, i32
  }
  func.func @transform_3(%arg0: i32) -> (i32, i32) {
    %c0_i32 = arith.constant 0 : i32
    %c0_i32_0 = arith.constant 0 : i32
    %c0_i32_1 = arith.constant 0 : i32
    return %c0_i32, %c0_i32_0 : i32, i32
  }
  func.func @transform_4(%arg0: i32) -> (i32, i32, i32) {
    %c0_i32 = arith.constant 0 : i32
    %c0_i32_0 = arith.constant 0 : i32
    %c0_i32_1 = arith.constant 0 : i32
    %c0_i32_2 = arith.constant 0 : i32
    return %c0_i32, %c0_i32_0, %c0_i32_1 : i32, i32, i32
  }
  func.func @transform_5(%arg0: i32) -> (i32, i32) {
    %c0_i32 = arith.constant 0 : i32
    %c0_i32_0 = arith.constant 0 : i32
    %c0_i32_1 = arith.constant 0 : i32
    return %c0_i32, %c0_i32_0 : i32, i32
  }
  func.func @transform_6(%arg0: i32) -> (i32, i32, i32) {
    %c0_i32 = arith.constant 0 : i32
    %c0_i32_0 = arith.constant 0 : i32
    %c0_i32_1 = arith.constant 0 : i32
    return %arg0, %c0_i32, %c0_i32_0 : i32, i32, i32
  }
}

</mosaic_0001>

<bundles_post_ra>
// kernel: tpu_custom_call.1
= control target key start
LH: loop header
LB: loop body
LE: loop exit
PB: predicated region body
PF: predicated region fallthrough
CT: control target
= control target key end

     0   :  { %s2478_s21 = smov 0   ;;  %s2926_s0 = inlined_call_operand.vmem [shape: f32[2,256,32], index: 0, kind: input, shape index: {}]   ;;  %s2927_s1 = inlined_call_operand.vmem [shape: f32[2,256,8], index: 1, kind: input, shape index: {}]   ;;  %s2928_s2 = inlined_call_operand.vmem [shape: f32[8,32], index: 2, kind: input, shape index: {}]   ;;  %s2929_s3 = inlined_call_operand.vmem [shape: f32[1,32], index: 3, kind: input, shape index: {}]   ;;  %s2930_s4 = inlined_call_operand.vmem [shape: bf16[9,32,64], index: 4, kind: input, shape index: {}]   ;;  %s2931_s5 = inlined_call_operand.vmem [shape: f32[1,64], index: 5, kind: input, shape index: {}]   ;;  %s2932_s6 = inlined_call_operand.vmem [shape: f32[2,256,32], index: 6, kind: output, shape index: {}]  }
   0x1 LB: > { %s1906_s22 = sadd.s32 4294967295, %s2431_s21   ;;  %p1910_p0 = scmp.ge.s32.totalorder %s2431_s21, 1  ;;  %s2431_s21 = sphi %s2478_s21, %s16_s21  }
   0x2   : > { %p222_p1 = scmp.lt.s32.totalorder %s2431_s21, 3 }
   0x4   : > { %p223_p2 = pnand %p1910_p0, %p222_p1 }
   0x5   : > { %p257_p3 = scmp.lt.s32.totalorder (!%p223_p2), %s1906_s22, 1  ;;  %vm273_vm0 = vcmask (!%p223_p2), 261120   ;;  %v2489_v0 = vld [vmem:[%s2928_s2] sm:$0xff] (!%p223_p2)  ;;  %v2441_v2 = vmov (!%p223_p2), 0.0   ;;  %s2516_s13 = smov (!%p223_p2), 0  }
   0x6   : > { %226 = sbr.rel (%p223_p2) target bundleno = 667 (0x29b), region = 44  ;;  %v2494_v1 = vld [vmem:[%s2929_s3] ss:$0 sm:$0xff] (!%p223_p2)  ;;  %274 = vst.msk [vmem:[#allocation2] sm:$0xff] (!%p223_p2), %vm273_vm0, %v2441_v2  ;;  %275 = vst.msk [vmem:[#allocation2 + $0x8] sm:$0xff] (!%p223_p2), %vm273_vm0, %v2441_v2 }
   0x7   : > { %276 = vst.msk [vmem:[#allocation2 + $0x10] sm:$0xff] (!%p223_p2), %vm273_vm0, %v2441_v2  ;;  %277 = vst.msk [vmem:[#allocation2 + $0x118] sm:$0xff] (!%p223_p2), %vm273_vm0, %v2441_v2 }
   0x8   : > { %278 = vst.msk [vmem:[#allocation2 + $0x120] sm:$0xff] (!%p223_p2), %vm273_vm0, %v2441_v2  ;;  %279 = vst.msk [vmem:[#allocation2 + $0x128] sm:$0xff] (!%p223_p2), %vm273_vm0, %v2441_v2 }
   0xd   : > { %s2950_s22 = smov (!%p257_p3, %s1906_s22), 1 }
   0xe   : > { %s2502_s27 = sshll.u32 %s2950_s22, 8 }
   0xf   : > { %s261_s30 = scalar_lea.vmem %s2926_s0, %s2502_s27  ;;  %s266_s9 = scalar_lea.vmem %s2927_s1, %s2502_s27 }
  0x10   : > { %s271_s12 = scalar_lea.vmem %s2932_s6, %s2502_s27 }
  0x11 LB: >> { %2173 = vmatprep.subr.mxu0 %v2489_v0  ;;  %2295 = vmatprep.subr.mxu1 %v2489_v0  ;;  %s1917_s14 = sshll.u32 %s2435_s13, 6  ;;  %vm304_vm1 = vcmask 64512   ;;  %s287_s13 = sadd.s32 1, %s2435_s13   ;;  %s2435_s13 = sphi %s2516_s13, %s287_s13  }
  0x12   : >> { %2174 = vmatpush3.msra.mxu0 %v2489_v0  ;;  %2296 = vmatpush3.msra.mxu1 %v2489_v0  ;;  %s289_s17 = scalar_lea.vmem %s266_s9, %s1917_s14  ;;  %s1833_s18 = scalar_lea.vmem [#allocation2], %s1917_s14 }
  0x13   : >> { %v290_v3 = vld [vmem:[%s289_s17] sm:$0xff]  ;;  %v291_v5 = vld [vmem:[%s289_s17 + $0x8] sm:$0xff]  ;;  %v292_v7 = vld [vmem:[%s289_s17 + $0x10] sm:$0xff]  ;;  %p284_p4 = scmp.ge.s32.totalorder %s287_s13, 4  }
  0x14   : >> { %v294_v4 = vld [vmem:[%s289_s17 + $0x20] sm:$0xff]  ;;  %2175 = vmatprep.mubr.msk.f32.mxu0 %vm304_vm1, %v290_v3  ;;  %v295_v6 = vld [vmem:[%s289_s17 + $0x28] sm:$0xff]  ;;  %v296_v8 = vld [vmem:[%s289_s17 + $0x30] sm:$0xff]  ;;  %s2562_s19 = smov (%p284_p4), 0  }
  0x15   : >> { %2181 = vmatprep.mubr.msk.f32.mxu1 %vm304_vm1, %v294_v4  ;;  %2176 = vmatmul.mubr.msk.f32.vlgmr.msra.gmra.mrb[0].mxu0 %vm304_vm1, %v291_v5  ;;  %v293_v9 = vld [vmem:[%s289_s17 + $0x18] sm:$0xff] }
  0x16   : >> { %2182 = vmatmul.mubr.msk.f32.vlgmr.msra.gmra.mrb[0].mxu1 %vm304_vm1, %v295_v6  ;;  %2178 = vmatprep.mubr.msk.f32.mxu0 %vm304_vm1, %v292_v7  ;;  %v297_v10 = vld [vmem:[%s289_s17 + $0x38] sm:$0xff] }
  0x17   : >> { %2184 = vmatprep.mubr.msk.f32.mxu1 %vm304_vm1, %v296_v8 }
  0x19   : >> { %2179 = vmatmul.mubr.msk.f32.gmra.mrb[2].mxu0 %vm304_vm1, %v293_v9 }
  0x1a   : >> { %2185 = vmatmul.mubr.msk.f32.gmra.mrb[2].mxu1 %vm304_vm1, %v297_v10 }
  0xe8   : >> { %v2177_v11 = vpop.f32.mrb[0].mxu0 }
  0xe9   : >> { %v2183_v12 = vpop.f32.mrb[0].mxu1  ;;  %v401_v13 = vadd.f32 %v2177_v11, %v2494_v1  ;;  %v395_v15 = vpop.f32.mrb[1].mxu0 }
  0xea   : >> { %v421_v14 = vadd.f32 %v2183_v12, %v2494_v1  ;;  %v415_v16 = vpop.f32.mrb[1].mxu1  ;;  %v396_v17 = vadd.f32 %v2494_v1, %v395_v15 }
  0xeb   : >> { %v416_v18 = vadd.f32 %v2494_v1, %v415_v16  ;;  %vm435_vm2 = vcmp.gt.f32.partialorder %v401_v13, 0.0  ;;  %v443_v19 = vmul.f32 0.01, %v401_v13 }
  0xec   : >> { %vm439_vm3 = vcmp.gt.f32.partialorder %v421_v14, 0.0  ;;  %v447_v20 = vmul.f32 0.01, %v421_v14  ;;  %vm434_vm4 = vcmp.gt.f32.partialorder %v396_v17, 0.0  ;;  %v442_v21 = vmul.f32 0.01, %v396_v17 }
  0xed   : >> { %vm438_vm5 = vcmp.gt.f32.partialorder %v416_v18, 0.0  ;;  %v446_v22 = vmul.f32 0.01, %v416_v18  ;;  %v451_v23 = vsel %vm435_vm2, %v401_v13, %v443_v19  ;;  %v2180_v25 = vpop.f32.mrb[2].mxu0  ;;  %v2186_v26 = vpop.f32.mrb[2].mxu1 }
  0xee   : >> { %v455_v24 = vsel %vm439_vm3, %v421_v14, %v447_v20  ;;  %1929 = vst.msk [vmem:[%s1833_s18 + $0x20] sm:$0xff] %vm273_vm0, %v451_v23  ;;  %v450_v27 = vsel %vm434_vm4, %v396_v17, %v442_v21  ;;  %v411_v29 = vadd.f32 %v2180_v25, %v2494_v1  ;;  %v431_v30 = vadd.f32 %v2186_v26, %v2494_v1  ;;  %v405_v31 = vpop.f32.mrb[3].mxu0  ;;  %v425_v32 = vpop.f32.mrb[3].mxu1 }
  0xef   : >> { %1933 = vst.msk [vmem:[%s1833_s18 + $0x40] sm:$0xff] %vm273_vm0, %v455_v24  ;;  %v454_v28 = vsel %vm438_vm5, %v416_v18, %v446_v22  ;;  %1928 = vst.msk [vmem:[%s1833_s18 + $0x18] sm:$0xff] %vm273_vm0, %v450_v27  ;;  %v406_v33 = vadd.f32 %v2494_v1, %v405_v31  ;;  %v426_v34 = vadd.f32 %v2494_v1, %v425_v32  ;;  %286 = sbr.rel (!%p284_p4) target bundleno = 17 (0x11), region = 112 }
  0xf0   : >> { %1932 = vst.msk [vmem:[%s1833_s18 + $0x38] sm:$0xff] %vm273_vm0, %v454_v28  ;;  %vm437_vm6 = vcmp.gt.f32.partialorder %v411_v29, 0.0  ;;  %v445_v35 = vmul.f32 0.01, %v411_v29  ;;  %vm441_vm7 = vcmp.gt.f32.partialorder %v431_v30, 0.0 }
  0xf1   : >> { %v449_v36 = vmul.f32 0.01, %v431_v30  ;;  %vm436_vm8 = vcmp.gt.f32.partialorder %v406_v33, 0.0  ;;  %v444_v37 = vmul.f32 0.01, %v406_v33  ;;  %vm440_vm9 = vcmp.gt.f32.partialorder %v426_v34, 0.0 }
  0xf2   : >> { %v448_v38 = vmul.f32 0.01, %v426_v34  ;;  %v453_v39 = vsel %vm437_vm6, %v411_v29, %v445_v35 }
  0xf3   : >> { %v457_v40 = vsel %vm441_vm7, %v431_v30, %v449_v36  ;;  %1931 = vst.msk [vmem:[%s1833_s18 + $0x30] sm:$0xff] %vm273_vm0, %v453_v39  ;;  %v452_v41 = vsel %vm436_vm8, %v406_v33, %v444_v37 }
  0xf4   : >> { %1935 = vst.msk [vmem:[%s1833_s18 + $0x50] sm:$0xff] %vm273_vm0, %v457_v40  ;;  %v456_v42 = vsel %vm440_vm9, %v426_v34, %v448_v38  ;;  %1930 = vst.msk [vmem:[%s1833_s18 + $0x28] sm:$0xff] %vm273_vm0, %v452_v41 }
  0xf5   : >> { %1934 = vst.msk [vmem:[%s1833_s18 + $0x48] sm:$0xff] %vm273_vm0, %v456_v42 }
  0xf6 LB: >> { %v2399_v43 = vld [vmem:[%s2930_s4] sm:$0xff]   ;;  %v475_v44 = vlaneseq  ;;  %v2401_v46 = vld [vmem:[%s2930_s4 + $0x8] sm:$0xff]   ;;  %s2579_s28 = sshll.u32 %s2439_s19, 6  ;;  %v2403_v54 = vld [vmem:[%s2930_s4 + $0x10] sm:$0xff]   ;;  %s473_s19 = sadd.s32 1, %s2439_s19   ;;  %s2439_s19 = sphi %s2562_s19, %s473_s19  }
  0xf7   : >> { %v2573_v45 = vld [vmem:[%s2930_s4 + $0x40] sm:$0xff]   ;;  %2187 = vmatprep.subr.bf16.mxu1 %v2399_v43  ;;  %v2585_v47 = vld [vmem:[%s2930_s4 + $0x48] sm:$0xff]   ;;  %s2589_s8 = scalar_lea.vmem [#allocation2], %s2579_s28  ;;  %v2404_v8 = vld [vmem:[%s2930_s4 + $0x50] sm:$0xff]   ;;  %s1727_s29 = scalar_lea.vmem %s261_s30, %s2579_s28 }
  0xf8   : >> { %2235 = vmatprep.subr.bf16.mxu0 %v2573_v45  ;;  %2188 = vmatpush3.bf16.msra.mxu1 %v2399_v43  ;;  %v2593_v50 = vshrl.u32 %v475_v44, 7  ;;  %v2406_v15 = vld [vmem:[%s2930_s4 + $0x58] sm:$0xff]   ;;  %v2407_v29 = vld [vmem:[%s2930_s4 + $0x60] sm:$0xff]   ;;  %v2416_v1 = vld [vmem:[%s2930_s4 + $0x88] sm:$0xff]   ;;  %s2902_s10 = scalar_lea.vmem %s271_s12, %s2579_s28  ;;  %p470_p5 = scmp.ge.s32.totalorder %s473_s19, 4  }
  0xf9   : >> { %2236 = vmatpush3.bf16.msra.mxu0 %v2573_v45  ;;  %2189 = vmatprep.subr.bf16.mxu1 %v2401_v46  ;;  %v2405_v17 = vld [vmem:[%s2930_s4 + $0x18] sm:$0xff]   ;;  %v2408_v35 = vld [vmem:[%s2930_s4 + $0x20] sm:$0xff]  }
  0xfa   : >> { %2237 = vmatprep.subr.bf16.mxu0 %v2585_v47  ;;  %v488_v53 = vand.u32 15, %v2593_v50  ;;  %v478_v57 = vadd.s32 16, %v2593_v50  ;;  %v480_v58 = vadd.s32 32, %v2593_v50  ;;  %v482_v63 = vadd.s32 48, %v2593_v50 }
  0xfb   : >> { %v477_v0 = vadd.s32 8, %v2593_v50  ;;  %v479_v6 = vadd.s32 24, %v2593_v50  ;;  %v481_v26 = vadd.s32 40, %v2593_v50  ;;  %v483_v41 = vadd.s32 56, %v2593_v50 }
  0xfc   : >> { %v2011_v48 = vld [vmem:[%s2589_s8 + $0x18] sm:$0xff]  ;;  %v2012_v49 = vld [vmem:[%s2589_s8 + $0x20] sm:$0xff]  ;;  %v2013_v55 = vld [vmem:[%s2589_s8 + $0x28] sm:$0xff]  ;;  %2190 = vmatpush3.bf16.msra.mxu1 %v2401_v46  ;;  %vm2621_vm10 = vcmp.gt.s32.totalorder %v488_v53, 0  ;;  %v502_v2 = vand.u32 15, %v478_v57  ;;  %v516_v5 = vand.u32 15, %v480_v58 }
  0xfd   : >> { %v2596_v51 = vpack.c.bf16 %v2012_v49, %v2011_v48  ;;  %v1939_v52 = vld [vmem:[%s2589_s8 + $0x7] sm:$0xff]  ;;  %v2014_v56 = vld [vmem:[%s2589_s8 + $0x30] sm:$0xff]  ;;  %v2616_v62 = vld [vmem:[%s2589_s8 + $0x1f] sm:$0xff]  ;;  %2238 = vmatpush3.bf16.msra.mxu0 %v2585_v47  ;;  %2199 = vmatprep.subr.bf16.mxu1 %v2403_v54  ;;  %v530_v18 = vand.u32 15, %v482_v63  ;;  %v495_v21 = vand.u32 15, %v477_v0  ;;  %v509_v24 = vand.u32 15, %v479_v6 }
  0xfe   : >> { %v1940_v59 = vld [vmem:[%s2589_s8 + $0xf] sm:$0xff]  ;;  %v2610_v60 = vpack.c.bf16 %v2014_v56, %v2013_v55  ;;  %v2613_v61 = vld [vmem:[%s2589_s8 + $0x17] sm:$0xff]  ;;  %v2626_v3 = vld [vmem:[%s2589_s8 + $0x27] sm:$0xff]  ;;  %v630_v7 = vsel %vm2621_vm10, %v1939_v52, 0.0  ;;  %vm2637_vm11 = vcmp.gt.s32.totalorder %v502_v2, 0  ;;  %vm2641_vm12 = vcmp.gt.s32.totalorder %v516_v5, 0  ;;  %2247 = vmatprep.subr.bf16.mxu0 %v2404_v8 }
  0xff   : >> { %2239 = vmatprep.mubr.msk.bf16.mxu0 %vm273_vm0, %v2596_v51  ;;  %v2629_v4 = vld [vmem:[%s2589_s8 + $0x2f] sm:$0xff]  ;;  %v638_v9 = vpack.c.bf16 %v1940_v59, %v630_v7  ;;  %v632_v12 = vsel %vm2637_vm11, %v2613_v61, 0.0  ;;  %v2651_v13 = vld [vmem:[%s2589_s8 + $0x37] sm:$0xff]  ;;  %v634_v14 = vsel %vm2641_vm12, %v2626_v3, 0.0  ;;  %v2665_v19 = vld [vmem:[%s2589_s8 + $0x3f] sm:$0xff]  ;;  %vm2679_vm13 = vcmp.gt.s32.totalorder %v530_v18, 0 }
 0x100   : >> { %2240 = vmatmul.mubr.msk.bf16.vlgmr.msra.gmra.mrb[0].mxu0 %vm273_vm0, %v2610_v60  ;;  %v639_v16 = vpack.c.bf16 %v2616_v62, %v632_v12  ;;  %v640_v20 = vpack.c.bf16 %v2629_v4, %v634_v14  ;;  %v2669_v22 = vld [vmem:[%s2589_s8 + $0x19] sm:$0xff]  ;;  %v2672_v23 = vld [vmem:[%s2589_s8 + $0x21] sm:$0xff]  ;;  %v2675_v25 = vld [vmem:[%s2589_s8 + $0x31] sm:$0xff]  ;;  %v636_v30 = vsel %vm2679_vm13, %v2651_v13, 0.0  ;;  %vm2693_vm14 = vcmp.lt.s32.totalorder %v495_v21, 15 }
 0x101   : >> { %2191 = vmatprep.mubr.msk.bf16.mxu1 %vm273_vm0, %v638_v9  ;;  %2248 = vmatpush3.bf16.msra.mxu0 %v2404_v8  ;;  %v2684_v28 = vld [vmem:[%s2589_s8 + $0x29] sm:$0xff]  ;;  %vm2697_vm15 = vcmp.lt.s32.totalorder %v509_v24, 15  ;;  %v1250_v36 = vsel %vm2693_vm14, %v2672_v23, 0.0  ;;  %v523_v39 = vand.u32 15, %v481_v26  ;;  %v2714_v40 = vld [vmem:[%s2589_s8 + $0x41] sm:$0xff]  ;;  %v641_v42 = vpack.c.bf16 %v2665_v19, %v636_v30  ;;  %v2719_v43 = vld [vmem:[%s2589_s8 + $0x39] sm:$0xff] }
 0x102   : >> { %2249 = vmatprep.subr.bf16.mxu0 %v2406_v15  ;;  %2192 = vmatmul.mubr.msk.bf16.vlgmr.msra.gmra.mrb[0].mxu1 %vm273_vm0, %v639_v16  ;;  %v1954_v33 = vld [vmem:[%s2589_s8 + $0x8] sm:$0xff]  ;;  %v1955_v34 = vld [vmem:[%s2589_s8 + $0x10] sm:$0xff]  ;;  %v1252_v37 = vsel %vm2697_vm15, %v2675_v25, 0.0  ;;  %v1257_v38 = vpack.c.bf16 %v1250_v36, %v2669_v22  ;;  %v537_v49 = vand.u32 15, %v483_v41  ;;  %v1373_v59 = vsel %vm2621_vm10, %v2626_v3, 0.0  ;;  %v1960_v7 = vld [vmem:[%s2589_s8 + $0x38] sm:$0xff] }
 0x103   : >> { %2200 = vmatpush3.bf16.msra.mxu1 %v2403_v54  ;;  %2195 = vmatprep.mubr.msk.bf16.mxu1 %vm273_vm0, %v640_v20  ;;  %v1258_v44 = vpack.c.bf16 %v1252_v37, %v2684_v28  ;;  %v753_v46 = vpack.c.bf16 %v1955_v34, %v1954_v33  ;;  %vm2723_vm1 = vcmp.lt.s32.totalorder %v523_v39, 15  ;;  %v2731_v52 = vld [vmem:[%s2589_s8 + $0x51] sm:$0xff]  ;;  %v2409_v55 = vld [vmem:[%s2930_s4 + $0x68] sm:$0xff]   ;;  %v1381_v2 = vpack.c.bf16 %v2629_v4, %v1373_v59  ;;  %v1961_v8 = vld [vmem:[%s2589_s8 + $0x40] sm:$0xff] }
 0x104   : >> { %2201 = vmatprep.subr.bf16.mxu1 %v2405_v17  ;;  %2251 = vmatprep.mubr.msk.bf16.mxu0 %vm273_vm0, %v1257_v38  ;;  %v1254_v50 = vsel %vm2723_vm1, %v2714_v40, 0.0  ;;  %vm2734_vm2 = vcmp.lt.s32.totalorder %v537_v49, 15  ;;  %v2746_v56 = vld [vmem:[%s2589_s8 + $0x49] sm:$0xff]  ;;  %v1974_v5 = vld [vmem:[%s2589_s8 + $0x11] sm:$0xff]  ;;  %v1375_v9 = vsel %vm2637_vm11, %v2651_v13, 0.0  ;;  %v2056_v30 = vld [vmem:[%s2589_s8 + $0x5f] sm:$0xff] }
 0x105   : >> { %2250 = vmatpush3.bf16.msra.mxu0 %v2406_v15  ;;  %v1259_v53 = vpack.c.bf16 %v1254_v50, %v2719_v43  ;;  %v1256_v57 = vsel %vm2734_vm2, %v2731_v52, 0.0  ;;  %v2411_v58 = vld [vmem:[%s2930_s4 + $0x70] sm:$0xff]   ;;  %v2410_v0 = vld [vmem:[%s2930_s4 + $0x28] sm:$0xff]   ;;  %v1382_v18 = vpack.c.bf16 %v2665_v19, %v1375_v9  ;;  %v2413_v26 = vld [vmem:[%s2930_s4 + $0x78] sm:$0xff]   ;;  %v890_v34 = vsel %vm2723_vm1, %v2675_v25, 0.0 }
 0x106   : >> { %2259 = vmatprep.subr.bf16.mxu0 %v2407_v29  ;;  %v1260_v63 = vpack.c.bf16 %v1256_v57, %v2746_v56  ;;  %v2766_v6 = vld [vmem:[%s2589_s8 + $0x47] sm:$0xff]  ;;  %v2412_v14 = vld [vmem:[%s2930_s4 + $0x30] sm:$0xff]   ;;  %v895_v37 = vpack.c.bf16 %v890_v34, %v2684_v28  ;;  %v2414_v38 = vld [vmem:[%s2930_s4 + $0x38] sm:$0xff]   ;;  %v892_v39 = vsel %vm2734_vm2, %v2714_v40, 0.0  ;;  %v1013_v50 = vsel %vm2641_vm12, %v2651_v13, 0.0 }
 0x107   : >> { %2202 = vmatpush3.bf16.msra.mxu1 %v2405_v17  ;;  %v1973_v12 = vld [vmem:[%s2589_s8 + $0x9] sm:$0xff]  ;;  %v1377_v16 = vsel %vm2641_vm12, %v2766_v6, 0.0  ;;  %v2789_v17 = vpack.c.bf16 %v1961_v8, %v1960_v7  ;;  %v2055_v24 = vld [vmem:[%s2589_s8 + $0x57] sm:$0xff]  ;;  %v1616_v11 = vsel %vm2697_vm15, %v2714_v40, 0.0  ;;  %v2094_v27 = vld [vmem:[%s2589_s8 + $0x61] sm:$0xff] }
 0x108   : >> { %2211 = vmatprep.subr.bf16.mxu1 %v2408_v35  ;;  %v2784_v15 = vld [vmem:[%s2589_s8 + $0x4f] sm:$0xff]  ;;  %v1379_v33 = vsel %vm2679_vm13, %v2055_v24, 0.0  ;;  %v1620_v31 = vsel %vm2734_vm2, %v2094_v27, 0.0 }
 0x109   : >> { %v1383_v21 = vpack.c.bf16 %v2784_v15, %v1377_v16  ;;  %v1384_v36 = vpack.c.bf16 %v2056_v30, %v1379_v33  ;;  %v2072_v41 = vld [vmem:[%s2589_s8 + $0x48] sm:$0xff] }
 0x10a   : >> { %2196 = vmatmul.mubr.msk.bf16.gmra.mrb[4].mxu1 %vm273_vm0, %v641_v42  ;;  %v2073_v42 = vld [vmem:[%s2589_s8 + $0x50] sm:$0xff] }
 0x10b   : >> { %2203 = vmatprep.mubr.msk.bf16.mxu1 %vm273_vm0, %v753_v46  ;;  %v1499_v49 = vpack.c.bf16 %v2073_v42, %v2072_v41 }
 0x10c   : >> { %2252 = vmatmul.mubr.msk.bf16.vlgmr.msra.gmra.mrb[0].mxu0 %vm273_vm0, %v1258_v44  ;;  %v896_v44 = vpack.c.bf16 %v892_v39, %v2719_v43 }
 0x10d   : >> { %2260 = vmatpush3.bf16.msra.mxu0 %v2407_v29  ;;  %2255 = vmatprep.mubr.msk.bf16.mxu0 %vm273_vm0, %v1259_v53  ;;  %v888_v29 = vsel %vm2697_vm15, %v2672_v23, 0.0 }
 0x10e   : >> { %2261 = vmatprep.subr.bf16.mxu0 %v2409_v55  ;;  %v894_v23 = vpack.c.bf16 %v888_v29, %v2669_v22  ;;  %v1009_v22 = vsel %vm2621_vm10, %v2613_v61, 0.0  ;;  %v2074_v61 = vld [vmem:[%s2589_s8 + $0x58] sm:$0xff] }
 0x10f   : >> { %v1017_v46 = vpack.c.bf16 %v2616_v62, %v1009_v22  ;;  %v2075_v62 = vld [vmem:[%s2589_s8 + $0x60] sm:$0xff]  ;;  %v1731_v22 = vld [vmem:[%s1727_s29 + $0x18] sm:$0xff] }
 0x110   : >> { %v1500_v10 = vpack.c.bf16 %v2075_v62, %v2074_v61 }
 0x111   : >> { %2262 = vmatpush3.bf16.msra.mxu0 %v2409_v55  ;;  %v1019_v55 = vpack.c.bf16 %v2665_v19, %v1013_v50  ;;  %v1622_v19 = vpack.c.bf16 %v1616_v11, %v2719_v43 }
 0x112   : >> { %2271 = vmatprep.subr.bf16.mxu0 %v2411_v58  ;;  %2204 = vmatmul.mubr.msk.bf16.vlgmr.msra.gmra.mrb[0].mxu1 %vm273_vm0, %v2596_v51  ;;  %v886_v51 = vsel %vm2693_vm14, %v1974_v5, 0.0 }
 0x113   : >> { %2212 = vmatpush3.bf16.msra.mxu1 %v2408_v35  ;;  %2207 = vmatprep.mubr.msk.bf16.mxu1 %vm273_vm0, %v2610_v60  ;;  %v893_v20 = vpack.c.bf16 %v886_v51, %v1973_v12  ;;  %v2415_v35 = vld [vmem:[%s2930_s4 + $0x80] sm:$0xff]  }
 0x114   : >> { %2256 = vmatmul.mubr.msk.bf16.gmra.mrb[4].mxu0 %vm273_vm0, %v1260_v63  ;;  %2213 = vmatprep.subr.bf16.mxu1 %v2410_v0 }
 0x115   : >> { %2263 = vmatprep.mubr.msk.bf16.mxu0 %vm273_vm0, %v1381_v2 }
 0x117   : >> { %2214 = vmatpush3.bf16.msra.mxu1 %v2410_v0 }
 0x118   : >> { %2223 = vmatprep.subr.bf16.mxu1 %v2412_v14 }
 0x11a   : >> { %2208 = vmatmul.mubr.msk.bf16.gmra.mrb[4].mxu1 %vm273_vm0, %v2789_v17 }
 0x11b   : >> { %2215 = vmatprep.mubr.msk.bf16.mxu1 %vm273_vm0, %v893_v20 }
 0x11c   : >> { %2264 = vmatmul.mubr.msk.bf16.vlgmr.msra.gmra.mrb[0].mxu0 %vm273_vm0, %v1382_v18 }
 0x11d   : >> { %2272 = vmatpush3.bf16.msra.mxu0 %v2411_v58  ;;  %2267 = vmatprep.mubr.msk.bf16.mxu0 %vm273_vm0, %v1383_v21 }
 0x11e   : >> { %2273 = vmatprep.subr.bf16.mxu0 %v2413_v26 }
 0x121   : >> { %2274 = vmatpush3.bf16.msra.mxu0 %v2413_v26 }
 0x122   : >> { %2283 = vmatprep.subr.bf16.mxu0 %v2415_v35  ;;  %2216 = vmatmul.mubr.msk.bf16.vlgmr.msra.gmra.mrb[0].mxu1 %vm273_vm0, %v894_v23  ;;  %v1730_v23 = vld [vmem:[%s1727_s29 + $0x10] sm:$0xff] }
 0x123   : >> { %2224 = vmatpush3.bf16.msra.mxu1 %v2412_v14  ;;  %2219 = vmatprep.mubr.msk.bf16.mxu1 %vm273_vm0, %v895_v37 }
 0x124   : >> { %2268 = vmatmul.mubr.msk.bf16.gmra.mrb[4].mxu0 %vm273_vm0, %v1384_v36  ;;  %2225 = vmatprep.subr.bf16.mxu1 %v2414_v38  ;;  %v1728_v36 = vld [vmem:[%s1727_s29] sm:$0xff] }
 0x125   : >> { %2275 = vmatprep.mubr.msk.bf16.mxu0 %vm273_vm0, %v2610_v60  ;;  %v1011_v60 = vsel %vm2637_vm11, %v2626_v3, 0.0  ;;  %v1614_v3 = vsel %vm2693_vm14, %v2675_v25, 0.0 }
 0x126   : >> { %v1018_v53 = vpack.c.bf16 %v2629_v4, %v1011_v60  ;;  %v1621_v57 = vpack.c.bf16 %v1614_v3, %v2684_v28  ;;  %v1015_v4 = vsel %vm2679_vm13, %v2766_v6, 0.0  ;;  %v2093_v28 = vld [vmem:[%s2589_s8 + $0x59] sm:$0xff]  ;;  %s2442_s8 = smov 96   ;;  %v1733_v3 = vld [vmem:[%s1727_s29 + $0x28] sm:$0xff] }
 0x127   : >> { %2226 = vmatpush3.bf16.msra.mxu1 %v2414_v38  ;;  %v1020_v13 = vpack.c.bf16 %v2784_v15, %v1015_v4  ;;  %v1624_v32 = vpack.c.bf16 %v1620_v31, %v2093_v28 }
 0x128   : >> { %2297 = vmatprep.subr.bf16.mxu1 %v2573_v45 }
 0x12a   : >> { %2220 = vmatmul.mubr.msk.bf16.gmra.mrb[4].mxu1 %vm273_vm0, %v896_v44  ;;  %v1729_v44 = vld [vmem:[%s1727_s29 + $0x8] sm:$0xff] }
 0x12b   : >> { %2227 = vmatprep.mubr.msk.bf16.mxu1 %vm273_vm0, %v1017_v46 }
 0x12c   : >> { %2276 = vmatmul.mubr.msk.bf16.vlgmr.msra.gmra.mrb[0].mxu0 %vm273_vm0, %v2789_v17 }
 0x12d   : >> { %2284 = vmatpush3.bf16.msra.mxu0 %v2415_v35  ;;  %2279 = vmatprep.mubr.msk.bf16.mxu0 %vm273_vm0, %v1499_v49 }
 0x12e   : >> { %2285 = vmatprep.subr.bf16.mxu0 %v2416_v1 }
 0x131   : >> { %2286 = vmatpush3.bf16.msra.mxu0 %v2416_v1 }
 0x132   : >> { %2228 = vmatmul.mubr.msk.bf16.vlgmr.msra.gmra.mrb[0].mxu1 %vm273_vm0, %v1018_v53  ;;  %v1732_v53 = vld [vmem:[%s1727_s29 + $0x20] sm:$0xff] }
 0x133   : >> { %2299 = vmatpush3.bf16.msra.mxu1 %v2573_v45  ;;  %2231 = vmatprep.mubr.msk.bf16.mxu1 %vm273_vm0, %v1019_v55  ;;  %v1618_v45 = vsel %vm2723_vm1, %v2731_v52, 0.0  ;;  %v1937_v52 = vld [vmem:[%s2931_s5] ss:$0 sm:$0xff] }
 0x134   : >> { %2280 = vmatmul.mubr.msk.bf16.gmra.mrb[4].mxu0 %vm273_vm0, %v1500_v10  ;;  %2298 = vmatprep.subr.bf16.mxu1 %v2585_v47  ;;  %v1623_v25 = vpack.c.bf16 %v1618_v45, %v2746_v56 }
 0x135   : >> { %2287 = vmatprep.mubr.msk.bf16.mxu0 %vm273_vm0, %v1621_v57  ;;  %v1734_v57 = vld [vmem:[%s1727_s29 + $0x30] sm:$0xff] }
 0x137   : >> { %2300 = vmatpush3.bf16.msra.mxu1 %v2585_v47 }
 0x13a   : >> { %2232 = vmatmul.mubr.msk.bf16.gmra.mrb[4].mxu1 %vm273_vm0, %v1020_v13  ;;  %v1735_v13 = vld [vmem:[%s1727_s29 + $0x38] sm:$0xff] }
 0x13b   : >> { %2243 = vmatprep.mubr.msk.bf16.mxu1 %vm273_vm0, %v2789_v17 }
 0x13c   : >> { %2288 = vmatmul.mubr.msk.bf16.vlgmr.msra.gmra.mrb[0].mxu0 %vm273_vm0, %v1622_v19 }
 0x13d   : >> { %2291 = vmatprep.mubr.msk.bf16.mxu0 %vm273_vm0, %v1623_v25 }
 0x144   : >> { %2292 = vmatmul.mubr.msk.bf16.gmra.mrb[4].mxu0 %vm273_vm0, %v1624_v32 }
 0x146   : >> { %2244 = vmatmul.mubr.msk.bf16.vlgmr.msra.gmra.mrb[4].mxu1 %vm273_vm0, %v1499_v49 }
 0x205   : >> { %v2229_v47 = vpop.f32.mrb[0].mxu1 }
 0x206   : >> { %v1084_v40 = vpop.f32.mrb[1].mxu1  ;;  %v2301_v56 = vadd.f32 %v2229_v47, %v1937_v52 }
 0x207   : >> { %v2230_v43 = vpop.f32.mrb[2].mxu1  ;;  %v2303_v58 = vadd.f32 %v1937_v52, %v1084_v40 }
 0x208   : >> { %v1087_v48 = vpop.f32.mrb[3].mxu1  ;;  %v2305_v63 = vadd.f32 %v2230_v43, %v1937_v52 }
 0x209   : >> { %v2307_v2 = vadd.f32 %v1937_v52, %v1087_v48 }
 0x20f   : >> { %v2289_v59 = vpop.f32.mrb[0].mxu0 }
 0x210   : >> { %v2302_v0 = vadd.f32 %v2301_v56, %v2289_v59  ;;  %v1688_v54 = vpop.f32.mrb[1].mxu0 }
 0x211   : >> { %v2304_v5 = vadd.f32 %v2303_v58, %v1688_v54  ;;  %v2290_v6 = vpop.f32.mrb[2].mxu0 }
 0x212   : >> { %v2306_v7 = vadd.f32 %v2305_v63, %v2290_v6  ;;  %v1691_v8 = vpop.f32.mrb[3].mxu0  ;;  %1756 = vrot.lane.b32.xlu1 %v2302_v0, %s2442_s8  ;;  %v1738_v37 = vmul.f32 %v2302_v0, %v1730_v23 }
 0x213   : >> { %v2308_v9 = vadd.f32 %v2307_v2, %v1691_v8  ;;  %1752 = vrot.lane.b32.xlu0 %v2304_v5, %s2442_s8  ;;  %v1736_v39 = vmul.f32 %v2304_v5, %v1728_v36 }
 0x214   : >> { %v1739_v49 = vmul.f32 %v2306_v7, %v1731_v22 }
 0x215   : >> { %v1737_v60 = vmul.f32 %v2308_v9, %v1729_v44 }
 0x216   : >> { %1758 = vrot.lane.b32.xlu1 %v2306_v7, %s2442_s8 }
 0x217   : >> { %v2293_v12 = vpop.f32.mrb[4].mxu0  ;;  %1754 = vrot.lane.b32.xlu0 %v2308_v9, %s2442_s8 }
 0x218   : >> { %v1704_v51 = vpop.f32.mrb[5].mxu0 }
 0x219   : >> { %v2294_v14 = vpop.f32.mrb[6].mxu0  ;;  %v2245_v15 = vpop.f32.mrb[4].mxu1 }
 0x21a   : >> { %v1707_v16 = vpop.f32.mrb[7].mxu0  ;;  %v2309_v17 = vadd.f32 %v2245_v15, %v1937_v52  ;;  %v1216_v18 = vpop.f32.mrb[5].mxu1 }
 0x21b   : >> { %v2311_v20 = vadd.f32 %v1937_v52, %v1216_v18  ;;  %v2246_v21 = vpop.f32.mrb[6].mxu1 }
 0x21c   : >> { %v2310_v24 = vadd.f32 %v2309_v17, %v2293_v12  ;;  %v2313_v26 = vadd.f32 %v2246_v21, %v1937_v52  ;;  %v1219_v29 = vpop.f32.mrb[7].mxu1 }
 0x21d   : >> { %v2312_v30 = vadd.f32 %v2311_v20, %v1704_v51  ;;  %v2315_v33 = vadd.f32 %v1937_v52, %v1219_v29 }
 0x21e   : >> { %v2314_v34 = vadd.f32 %v2313_v26, %v2294_v14  ;;  %v1742_v25 = vmul.f32 %v2310_v24, %v1734_v57 }
 0x21f   : >> { %v2316_v35 = vadd.f32 %v2315_v33, %v1707_v16  ;;  %1760 = vrot.lane.b32.xlu0 %v2312_v30, %s2442_s8  ;;  %v1740_v10 = vmul.f32 %v2312_v30, %v1732_v53 }
 0x220   : >> { %v1743_v31 = vmul.f32 %v2314_v34, %v1735_v13 }
 0x221   : >> { %1762 = vrot.lane.b32.xlu1 %v2316_v35, %s2442_s8  ;;  %v1741_v11 = vmul.f32 %v2316_v35, %v1733_v3 }
 0x223   : >> { %1764 = vrot.lane.b32.xlu0 %v2310_v24, %s2442_s8 }
 0x225   : >> { %1766 = vrot.lane.b32.xlu1 %v2314_v34, %s2442_s8 }
 0x284   : >> { %v1757_v38 = vpop.permute.xlu1 %1756 }
 0x285   : >> { %v1778_v41 = vadd.f32 %v1757_v38, %v1738_v37  ;;  %v1753_v42 = vpop.permute.xlu0 %1752 }
 0x286   : >> { %v1776_v46 = vadd.f32 %v1753_v42, %v1736_v39 }
 0x287   : >> { %1787 = vst.msk [vmem:[%s2902_s10 + $0x10] sm:$0xff] %vm273_vm0, %v1778_v41 }
 0x288   : >> { %1785 = vst.msk [vmem:[%s2902_s10] sm:$0xff] %vm273_vm0, %v1776_v46  ;;  %v1759_v1 = vpop.permute.xlu1 %1758 }
 0x289   : >> { %v1779_v61 = vadd.f32 %v1759_v1, %v1739_v49  ;;  %v1755_v62 = vpop.permute.xlu0 %1754 }
 0x28a   : >> { %v1777_v50 = vadd.f32 %v1755_v62, %v1737_v60 }
 0x28b   : >> { %1788 = vst.msk [vmem:[%s2902_s10 + $0x18] sm:$0xff] %vm273_vm0, %v1779_v61 }
 0x28c   : >> { %1786 = vst.msk [vmem:[%s2902_s10 + $0x8] sm:$0xff] %vm273_vm0, %v1777_v50 }
 0x291   : >> { %v1761_v55 = vpop.permute.xlu0 %1760 }
 0x292   : >> { %v1780_v4 = vadd.f32 %v1761_v55, %v1740_v10 }
 0x293   : >> { %v1763_v45 = vpop.permute.xlu1 %1762 }
 0x294   : >> { %1789 = vst.msk [vmem:[%s2902_s10 + $0x20] sm:$0xff] %vm273_vm0, %v1780_v4  ;;  %v1781_v19 = vadd.f32 %v1763_v45, %v1741_v11  ;;  %472 = sbr.rel (!%p470_p5) target bundleno = 246 (0xf6), region = 123 }
 0x295   : >> { %v1765_v27 = vpop.permute.xlu0 %1764 }
 0x296   : >> { %1790 = vst.msk [vmem:[%s2902_s10 + $0x28] sm:$0xff] %vm273_vm0, %v1781_v19  ;;  %v1782_v28 = vadd.f32 %v1765_v27, %v1742_v25 }
 0x297   : >> { %v1767_v32 = vpop.permute.xlu1 %1766 }
 0x298   : >> { %1791 = vst.msk [vmem:[%s2902_s10 + $0x30] sm:$0xff] %vm273_vm0, %v1782_v28  ;;  %v1783_v47 = vadd.f32 %v1767_v32, %v1743_v31 }
 0x29a   : >> { %1792 = vst.msk [vmem:[%s2902_s10 + $0x38] sm:$0xff] %vm273_vm0, %v1783_v47 }
 0x29b PF: > { %s16_s21 = sadd.s32 1, %s2431_s21  }
 0x29c   : > { %p13_p6 = scmp.ge.s32.totalorder %s16_s21, 4  }
 0x29e   :  { %15 = sbr.rel (!%p13_p6) target bundleno = 1 (0x1), region = 134 }

</bundles_post_ra>
